<compile_context>
chip_gen: v6e
topology: v6e:2x2x1
jax: 0.10.0
libtpu: 0.0.40
codegen_flags: <defaults>
</compile_context>

<pallas_src>
import math
from functools import partial
from typing import Optional, Tuple

import numpy as np
import jax
import jax.numpy as jnp
from jax import lax
from jax.experimental import pallas as pl
from jax.experimental.pallas import tpu as pltpu


def _rope_angles_kernel(off_ref, freq_ref, qoff_ref, out_ref, *, k: int):
    """One [TR, W] packed tile of the RoPE angle table (W = k * D lanes).

    Packed layout: packed row g, lane l  <->  sequence row g*k + l//D,
    channel l % D.  freq_ref / qoff_ref are precomputed [1, W] rows with the
    interpolation scale folded in:
        freq_ref[l] = scale * inv_freq_rep[l % D]
        qoff_ref[l] = (l // D) * scale * inv_freq_rep[l % D]
    so   angle[g, l] = (g*k + offset) * freq_ref[l] + qoff_ref[l].
    """
    tr = out_ref.shape[0]
    base = pl.program_id(0) * (tr * k) + off_ref[0]            # int32 scalar
    g = lax.broadcasted_iota(jnp.int32, out_ref.shape, 0)       # packed row idx
    pos = (g * k + base).astype(jnp.float32)
    out_ref[...] = pos * freq_ref[...] + qoff_ref[...]


def _rope_cos_sin_kernel(off_ref, freq_ref, qoff_ref, cos_ref, sin_ref, *, k: int):
    """Fused variant: emit cos/sin tables directly (transcendentals on EUP)."""
    tr = cos_ref.shape[0]
    base = pl.program_id(0) * (tr * k) + off_ref[0]
    g = lax.broadcasted_iota(jnp.int32, cos_ref.shape, 0)
    pos = (g * k + base).astype(jnp.float32)
    ang = pos * freq_ref[...] + qoff_ref[...]
    cos_ref[...] = jnp.cos(ang)
    sin_ref[...] = jnp.sin(ang)


class RotaryEmbedding:
    """JAX/Pallas port of megatron-core RotaryEmbedding (forward only)."""

    def __init__(
        self,
        kv_channels: int,
        rotary_percent: float,
        rotary_interleaved: bool = False,
        seq_len_interpolation_factor: Optional[float] = None,
        rotary_base: int = 10000,
        rope_scaling: bool = False,
        rope_scaling_factor: float = 8.0,
        seq_tile: int = 8192,
        core_parallel: bool = False,
    ) -> None:
        dim = kv_channels
        if rotary_percent < 1.0:
            dim = int(dim * rotary_percent)
        self.dim = dim
        self.rotary_interleaved = rotary_interleaved
        self.seq_len_interpolation_factor = seq_len_interpolation_factor
        # Max sequence rows per grid step (rounded to packing / 8-sublane granule).
        self.seq_tile = max(1, int(seq_tile))
        # Opt-in: split the seq-tile axis across v7x's two TensorCores.
        self.core_parallel = bool(core_parallel)

        inv_freq = 1.0 / (
            rotary_base ** (jnp.arange(0, dim, 2, dtype=jnp.float32) / dim)
        )
        if rope_scaling:
            inv_freq = self._apply_scaling(inv_freq, factor=rope_scaling_factor)
        self.inv_freq = inv_freq

        # Static channel layout of the embedding table's last dim:
        #   non-interleaved: [f0..f_{h-1}, f0..f_{h-1}]   (torch.cat)
        #   interleaved:     [f0, f0, f1, f1, ...]        (torch.stack+view)
        if rotary_interleaved:
            freq_rep = jnp.stack([inv_freq, inv_freq], axis=-1).reshape(-1)
        else:
            freq_rep = jnp.concatenate([inv_freq, inv_freq], axis=0)
        D = int(freq_rep.shape[0])
        self.emb_dim = D

        # Lane packing: fold k sequence rows into one output row so the kernel's
        # last dim W = k*D is a multiple of 128 lanes (>= 512 when possible)
        # -> unmasked, lane-dense vst stores on all generations.
        k = 128 // math.gcd(D, 128)
        while k * D < 512:
            k *= 2
        self.pack = k
        self.width = W = k * D

        # Fold the seq-len-interpolation scale into the frequency rows.
        scale = (
            1.0
            if seq_len_interpolation_factor is None
            else 1.0 / float(seq_len_interpolation_factor)
        )
        freq_tiled = jnp.tile(freq_rep.astype(jnp.float32), (k,))            # [W]
        q = jnp.repeat(jnp.arange(k, dtype=jnp.float32), D)                  # [W]
        self.freq_row = (freq_tiled * scale).reshape(1, W).astype(jnp.float32)
        self.qoff_row = (q * freq_tiled * scale).reshape(1, W).astype(jnp.float32)

        # One compiled pallas fn per (max_seq_len, fused); offset is a runtime
        # SMEM scalar so decode-loop offset changes never recompile.
        self._fn_cache = {}

        # TODO(synk): cp_group slicing (get_pos_emb_on_this_cp_rank) is a
        # distributed no-op at context-parallel size 1 and is not implemented.

    @staticmethod
    def _apply_scaling(
        freqs,
        factor: float = 8.0,
        low_freq_factor: float = 1.0,
        high_freq_factor: float = 4.0,
        original_max_position_embeddings: int = 8192,
    ):
        old_context_len = original_max_position_embeddings
        low_freq_wavelen = old_context_len / low_freq_factor
        high_freq_wavelen = old_context_len / high_freq_factor
        wavelen = 2.0 * math.pi / freqs
        inv_freq_llama = jnp.where(wavelen > low_freq_wavelen, freqs / factor, freqs)
        smooth_factor = (old_context_len / wavelen - low_freq_factor) / (
            high_freq_factor - low_freq_factor
        )
        smoothed_inv_freq = (
            (1.0 - smooth_factor) * inv_freq_llama / factor
            + smooth_factor * inv_freq_llama
        )
        is_medium_freq = (~(wavelen < high_freq_wavelen)) & (~(wavelen > low_freq_wavelen))
        return jnp.where(is_medium_freq, smoothed_inv_freq, inv_freq_llama)

    # ---- small pure-JAX helpers mirroring the torch API (not hot-path) ------
    def get_freqs_non_repeated(self, max_seq_len: int, offset: int = 0):
        seq = jnp.arange(max_seq_len, dtype=jnp.float32) + offset
        if self.seq_len_interpolation_factor is not None:
            seq = seq * (1.0 / self.seq_len_interpolation_factor)
        return jnp.outer(seq, self.inv_freq)

    def get_cos_sin(self, max_seq_len: int, offset: int = 0) -> Tuple[jnp.ndarray, jnp.ndarray]:
        freqs = self.get_freqs_non_repeated(max_seq_len, offset)
        return jnp.cos(freqs), jnp.sin(freqs)

    # ---- pallas builder ------------------------------------------------------
    def _build(self, S: int, fused: bool):
        D, k, W = self.emb_dim, self.pack, self.width
        R = -(-S // k)                     # packed rows (sequence rows / k, ceil)
        s_pad = R * k                      # <= k-1 padded rows, sliced off below

        # Tile the packed-row axis.  Target 2-4 MiB of output per grid step
        # (double-buffered this stays well under v5e's 16 MiB scoped-VMEM
        # default); respect the user's seq_tile cap; tiled blocks must keep
        # 8-sublane alignment, so round (never fails lowering).
        row_bytes = W * 4
        target_bytes = (2 if fused else 4) * 1024 * 1024
        tr = max(8, (target_bytes // row_bytes) // 8 * 8)
        tr = min(tr, max(1, self.seq_tile // k))
        tr = min(tr, R)
        if tr < R:
            tr = max(8, (tr // 8) * 8)
        n_tiles = pl.cdiv(R, tr)

        sem = pltpu.CORE_PARALLEL if self.core_parallel else "parallel"
        kernel = partial(_rope_cos_sin_kernel if fused else _rope_angles_kernel, k=k)

        one = jax.ShapeDtypeStruct((R, W), jnp.float32)
        out_shape = (one, one) if fused else one
        if fused:
            out_specs = (pl.BlockSpec((tr, W), lambda i, off: (i, 0)),
                         pl.BlockSpec((tr, W), lambda i, off: (i, 0)))
        else:
            out_specs = pl.BlockSpec((tr, W), lambda i, off: (i, 0))

        call = pl.pallas_call(
            kernel,
            out_shape=out_shape,
            grid_spec=pltpu.PrefetchScalarGridSpec(
                num_scalar_prefetch=1,            # offset -> SMEM scalar
                grid=(n_tiles,),
                in_specs=[
                    pl.BlockSpec((1, W), lambda i, off: (0, 0)),   # scaled freq row
                    pl.BlockSpec((1, W), lambda i, off: (0, 0)),   # q*freq offset row
                ],
                out_specs=out_specs,
            ),
            compiler_params=pltpu.CompilerParams(dimension_semantics=(sem,)),
        )

        def unpack(t2d):
            # [R, k*D] -> [s_pad, D] is a row-major-contiguous reshape; drop the
            # (at most k-1) padded trailing rows, add the head/batch singletons.
            return t2d.reshape(s_pad, D)[:S][:, None, None, :]

        if fused:
            def run(off, freq, qoff):
                c, s = call(off, freq, qoff)
                return unpack(c), unpack(s)
        else:
            def run(off, freq, qoff):
                return unpack(call(off, freq, qoff))
        return jax.jit(run)

    def _get_fn(self, S: int, fused: bool):
        key = (S, fused)
        if key not in self._fn_cache:
            self._fn_cache[key] = self._build(S, fused)
        return self._fn_cache[key]

    # ---- forward -------------------------------------------------------------
    def __call__(self, max_seq_len: int, offset: int = 0, packed_seq: bool = False) -> jnp.ndarray:
        # Positions < 2^24 (plus offset) are exact in float32; matches the
        # torch float32 path.
        del packed_seq  # only relevant for the context-parallel branch (cp=1 here)
        S = int(max_seq_len)
        off = jnp.asarray([int(offset)], dtype=jnp.int32)
        return self._get_fn(S, fused=False)(off, self.freq_row, self.qoff_row)

    def forward_cos_sin(self, max_seq_len: int, offset: int = 0):
        """Fused extension: (cos, sin) of the full embedding table, each [S,1,1,D]."""
        S = int(max_seq_len)
        off = jnp.asarray([int(offset)], dtype=jnp.int32)
        return self._get_fn(S, fused=True)(off, self.freq_row, self.qoff_row)


def _reference(inv_freq, max_seq_len, offset, interp_factor, interleaved):
    """Pure-JAX port of the torch forward (cp size 1)."""
    seq = jnp.arange(max_seq_len, dtype=jnp.float32) + offset
    if interp_factor is not None:
        seq = seq * (1.0 / interp_factor)
    freqs = jnp.outer(seq, inv_freq)                                   # [S, half]
    if not interleaved:
        emb = jnp.concatenate([freqs, freqs], axis=-1)                 # [S, D]
    else:
        emb = jnp.stack(
            [freqs.reshape(-1, 1), freqs.reshape(-1, 1)], axis=-1
        ).reshape(freqs.shape[0], -1)                                  # [S, D]
    return emb[:, None, None, :]                                       # [S,1,1,D]


if __name__ == "__main__":
    key = jax.random.PRNGKey(0)
    # Forward inputs are just (max_seq_len, offset); derive a deterministic
    # offset from the PRNG key.
    offset = int(jax.random.randint(key, (), minval=0, maxval=16))

    # Case 1: default non-interleaved RoPE (D=32 -> packed to 512 lanes, k=16).
    rope = RotaryEmbedding(kv_channels=32, rotary_percent=1.0)
    out = jax.block_until_ready(rope(8, offset=offset))
    assert out.shape == (8, 1, 1, 32) and out.dtype == jnp.float32
    ref = _reference(rope.inv_freq, 8, offset, None, False)
    np.testing.assert_allclose(np.asarray(out), np.asarray(ref), rtol=1e-6, atol=1e-6)
    # Runtime SMEM offset: a different offset reuses the same compiled kernel.
    out_b = jax.block_until_ready(rope(8, offset=offset + 3))
    ref_b = _reference(rope.inv_freq, 8, offset + 3, None, False)
    np.testing.assert_allclose(np.asarray(out_b), np.asarray(ref_b), rtol=1e-6, atol=1e-6)

    # Case 2: interleaved + seq-len interpolation, multi-tile grid with a
    # partial trailing tile and row padding (S=100 not a multiple of k=8).
    rope2 = RotaryEmbedding(
        kv_channels=64,
        rotary_percent=1.0,
        rotary_interleaved=True,
        seq_len_interpolation_factor=2.0,
        seq_tile=64,
    )
    out2 = jax.block_until_ready(rope2(100, offset=0))
    assert out2.shape == (100, 1, 1, 64)
    ref2 = _reference(rope2.inv_freq, 100, 0, 2.0, True)
    np.testing.assert_allclose(np.asarray(out2), np.asarray(ref2), rtol=1e-6, atol=1e-6)

    # Case 3: llama-3.x rope scaling + rotary_percent < 1 (D=16 -> k=32, padded rows).
    rope3 = RotaryEmbedding(
        kv_channels=32, rotary_percent=0.5, rope_scaling=True, rope_scaling_factor=8.0
    )
    out3 = jax.block_until_ready(rope3(16, offset=0))
    assert out3.shape == (16, 1, 1, 16)
    ref3 = _reference(rope3.inv_freq, 16, 0, None, False)
    np.testing.assert_allclose(np.asarray(out3), np.asarray(ref3), rtol=1e-6, atol=1e-6)

    # Case 4: fused cos/sin tables straight from the kernel (EUP).
    cos4, sin4 = rope.forward_cos_sin(8, offset=offset)
    jax.block_until_ready((cos4, sin4))
    assert cos4.shape == (8, 1, 1, 32) and sin4.shape == (8, 1, 1, 32)
    np.testing.assert_allclose(np.asarray(cos4), np.cos(np.asarray(ref)), rtol=1e-5, atol=1e-5)
    np.testing.assert_allclose(np.asarray(sin4), np.sin(np.asarray(ref)), rtol=1e-5, atol=1e-5)

    print("KERNEL_OK")
</pallas_src>

<mosaic_0001>
module attributes {stable_mosaic.version = 11 : i64} {
  func.func @_rope_angles_kernel(%arg0: i32, %arg1: memref<1xi32, #tpu.memory_space<smem>>, %arg2: memref<1x512xf32, #tpu.memory_space<vmem>>, %arg3: memref<1x512xf32, #tpu.memory_space<vmem>>, %arg4: memref<1x512xf32, #tpu.memory_space<vmem>>) attributes {dimension_semantics = [#tpu.dimension_semantics<parallel>], iteration_bounds = array<i64: 1>, scalar_prefetch = 1 : i64, scratch_operands = 0 : i64, tpu.core_type = #tpu.core_type<tc>, window_params = [{pipeline_mode = #tpu.pipeline_mode<synchronous>, transform_indices = @transform_0, window_bounds = array<i64: 1, 512>}, {pipeline_mode = #tpu.pipeline_mode<synchronous>, transform_indices = @transform_1, window_bounds = array<i64: 1, 512>}, {transform_indices = @transform_2, window_bounds = array<i64: 1, 512>}]} {
    %c16_i32 = arith.constant 16 : i32
    %0 = arith.muli %arg0, %c16_i32 : i32
    %c0 = arith.constant 0 : index
    %1 = memref.load %arg1[%c0] : memref<1xi32, #tpu.memory_space<smem>>
    %2 = arith.addi %0, %1 : i32
    %3 = tpu.iota {dimensions = array<i32: 0>} : vector<1x512xi32>
    %c16_i32_0 = arith.constant 16 : i32
    %4 = vector.broadcast %c16_i32_0 : i32 to vector<1x512xi32>
    %5 = arith.muli %3, %4 : vector<1x512xi32>
    %6 = vector.broadcast %2 : i32 to vector<1x512xi32>
    %7 = arith.addi %5, %6 : vector<1x512xi32>
    %8 = arith.sitofp %7 : vector<1x512xi32> to vector<1x512xf32>
    %c0_1 = arith.constant 0 : index
    %c0_2 = arith.constant 0 : index
    %9 = vector.load %arg2[%c0_1, %c0_2] : memref<1x512xf32, #tpu.memory_space<vmem>>, vector<1x512xf32>
    %10 = arith.mulf %8, %9 : vector<1x512xf32>
    %c0_3 = arith.constant 0 : index
    %c0_4 = arith.constant 0 : index
    %11 = vector.load %arg3[%c0_3, %c0_4] : memref<1x512xf32, #tpu.memory_space<vmem>>, vector<1x512xf32>
    %12 = arith.addf %10, %11 : vector<1x512xf32>
    %c0_5 = arith.constant 0 : index
    %c0_6 = arith.constant 0 : index
    %13 = vector.load %arg4[%c0_5, %c0_6] : memref<1x512xf32, #tpu.memory_space<vmem>>, vector<1x512xf32>
    tpu.vector_store %arg4[%c0_5, %c0_6], %12 {strides = array<i32>} : memref<1x512xf32, #tpu.memory_space<vmem>>, vector<1x512xf32>,
    return
  }
  func.func @transform_0(%arg0: i32, %arg1: memref<1xi32, #tpu.memory_space<smem>>) -> (i32, i32) {
    %c0_i32 = arith.constant 0 : i32
    %c0_i32_0 = arith.constant 0 : i32
    %c0_i32_1 = arith.constant 0 : i32
    return %c0_i32, %c0_i32_0 : i32, i32
  }
  func.func @transform_1(%arg0: i32, %arg1: memref<1xi32, #tpu.memory_space<smem>>) -> (i32, i32) {
    %c0_i32 = arith.constant 0 : i32
    %c0_i32_0 = arith.constant 0 : i32
    %c0_i32_1 = arith.constant 0 : i32
    return %c0_i32, %c0_i32_0 : i32, i32
  }
  func.func @transform_2(%arg0: i32, %arg1: memref<1xi32, #tpu.memory_space<smem>>) -> (i32, i32) {
    %c0_i32 = arith.constant 0 : i32
    %c0_i32_0 = arith.constant 0 : i32
    return %arg0, %c0_i32 : i32, i32
  }
}

</mosaic_0001>

<bundles_post_ra>
// kernel: run.1
= control target key start
LH: loop header
LB: loop body
LE: loop exit
PB: predicated region body
PF: predicated region fallthrough
CT: control target
= control target key end

     0   :  { %9 = vsyncpa [#allocation5], 0  ;;  %s220_s0 = inlined_call_operand.<no memory space> [shape: s32[1], index: 0, kind: input, shape index: {}]   ;;  %s221_s1 = inlined_call_operand.hbm [shape: f32[1,512], index: 1, kind: input, shape index: {}]   ;;  %s222_s2 = inlined_call_operand.hbm [shape: f32[1,512], index: 2, kind: input, shape index: {}]   ;;  %s223_s3 = inlined_call_operand.vmem [shape: f32[1,512], index: 3, kind: output, shape index: {}]  }
   0x1   :  { %10 = vsyncpa [#allocation7], 0  ;;  %s185_s12 = smov [#allocation4]   ;;  %s186_s14 = smov [#allocation6]  }
   0x2   :  { %s17_s13 = sshll.u32 %s185_s12, 4  ;;  %s27_s15 = sshll.u32 %s186_s14, 4  ;;  %s18_s13 = int_to_ptr.vmem [resolvable:$true] %s17_s13  ;;  %s28_s15 = int_to_ptr.vmem [resolvable:$true] %s27_s15 }
   0x3   :  { %s149_s16 = scalar_lea.vmem %s18_s13, 64  ;;  %p154_p1 = scmp.lt.s32.totalorder %s18_s13, %s18_s13 }
   0x4   :  { %p150_p0 = scmp.ne.s32.totalorder %s18_s13, %s149_s16  ;;  %p155_p2 = scmp.lt.s32.totalorder %s149_s16, %s149_s16 }
   0x6   :  { %p156_p3 = por %p155_p2, %p154_p1 }
   0x8   :  { %p157_p4 = pnand %p156_p3, %p150_p0 }
   0xa   :  { %160 = shalt.err (!%p157_p4)
}
   0xb   :  { %20 = dma.hbm_to_vmem [thread:$0]  %s221_s1, 64, %s18_s13, [#allocation5]  }
   0xc   :  { %s169_s19 = scalar_lea.vmem %s28_s15, 64  ;;  %p174_p6 = scmp.lt.s32.totalorder %s28_s15, %s28_s15 }
   0xd   :  { %p170_p5 = scmp.ne.s32.totalorder %s28_s15, %s169_s19  ;;  %p175_p7 = scmp.lt.s32.totalorder %s169_s19, %s169_s19 }
   0xf   :  { %p176_p8 = por %p175_p7, %p174_p6 }
  0x11   :  { %p177_p9 = pnand %p176_p8, %p170_p5 }
  0x13   :  { %180 = shalt.err (!%p177_p9)
}
  0x14   :  { %30 = dma.hbm_to_vmem [thread:$0]  %s222_s2, 64, %s28_s15, [#allocation7]  }
  0x15   :  { %181 = dma.done.wait [#allocation5], 64  }
  0x16   :  { %182 = vsyncadd [#allocation5], 4294967232 }
  0x17   :  { %183 = dma.done.wait [#allocation7], 64  }
  0x18   :  { %184 = vsyncadd [#allocation7], 4294967232  ;;  %v40_v0 = vlaneseq  ;;  %v43_v2 = vstv %s220_s0  ;;  %v187_v3 = vmov 1966171168   ;;  %v46_v11 = vld [vmem:[#allocation4] sm:$0xf] }
  0x19   :  { %v105_v4 = vunpack.c.l.s4 %v187_v3  ;;  %v72_v12 = vld [vmem:[#allocation6] sm:$0xf] }
  0x1a   :  { %v41_v1 = vshrl.u32 %v40_v0, 7  ;;  %vm129_vm0 = vcmp.lt.s32.totalorder %v40_v0, 512 }
  0x1b   :  { %v106_v13 = vunpack.c.0.s8 %v105_v4 }
  0x1c   :  { %v42_v5 = vmul.u32 16, %v41_v1  ;;  %v50_v6 = vsub.s32 0, %v41_v1  ;;  %v54_v7 = vsub.s32 1, %v41_v1  ;;  %v58_v8 = vsub.s32 2, %v41_v1 }
  0x1d   :  { %v62_v9 = vsub.s32 3, %v41_v1  ;;  %v109_v30 = vsub.s32 %v106_v13, %v41_v1 }
  0x1e   :  { %v44_v10 = vadd.s32 %v43_v2, %v42_v5  ;;  %v51_v15 = vrot.slane %v46_v11, %v50_v6  ;;  %v55_v16 = vrot.slane %v46_v11, %v54_v7  ;;  %v59_v17 = vrot.slane %v46_v11, %v58_v8 }
  0x1f   :  { %v63_v18 = vrot.slane %v46_v11, %v62_v9  ;;  %v77_v19 = vrot.slane %v72_v12, %v50_v6  ;;  %v81_v20 = vrot.slane %v72_v12, %v54_v7  ;;  %v85_v21 = vrot.slane %v72_v12, %v58_v8 }
  0x20   :  { %v45_v14 = vcvt.s32.f32 %v44_v10  ;;  %v89_v25 = vrot.slane %v72_v12, %v62_v9 }
  0x22   :  { %v68_v22 = vmul.f32 %v51_v15, %v45_v14  ;;  %v69_v23 = vmul.f32 %v55_v16, %v45_v14  ;;  %v70_v24 = vmul.f32 %v59_v17, %v45_v14  ;;  %v71_v26 = vmul.f32 %v63_v18, %v45_v14 }
  0x24   :  { %v94_v27 = vadd.f32 %v77_v19, %v68_v22  ;;  %v95_v28 = vadd.f32 %v81_v20, %v69_v23  ;;  %v96_v29 = vadd.f32 %v85_v21, %v70_v24  ;;  %v97_v31 = vadd.f32 %v89_v25, %v71_v26 }
  0x26   :  { %v102_v32 = vcombine.low %v94_v27, %v95_v28  ;;  %v103_v33 = vcombine.low %v96_v29, %v97_v31 }
  0x28   :  { %v110_v34 = vrot.slane %v102_v32, %v109_v30  ;;  %v117_v35 = vrot.slane %v103_v33, %v109_v30 }
  0x2a   :  { %v118_v36 = vcombine.low %v110_v34, %v117_v35 }
  0x2c   :  { %v125_v37 = vrot.slane %v118_v36, %v109_v30 }
  0x2e   :  { %131 = vst.msk [vmem:[%s223_s3] sm:$0xf] %vm129_vm0, %v125_v37 }
  0x2f   :  { %136 = vsyncpa [#allocation5], 1 }
  0x30   :  { %137 = vsyncpa [#allocation7], 1 }

</bundles_post_ra>
